<compile_context>
chip_gen: v7x
topology: tpu7x:2x2x1
jax: 0.10.0
libtpu: 0.0.40
codegen_flags: <defaults>
</compile_context>

<pallas_src>
import math
from functools import partial

import jax
import jax.numpy as jnp
from jax.experimental import pallas as pl
from jax.experimental.pallas import tpu as pltpu


# Target number of packed rows (each packed row = `pack` patches) per grid
# step.  At pack*K = 256 bf16 lanes this is ~0.5 MiB per input buffer and
# ~0.5 MiB per f32 output buffer (x2 for double buffering) -- far below the
# VMEM limit while amortizing the ~0.35 us per-grid-step overhead.
_TILE_ROWS = 1024
# Cap on the lane-packing factor (keeps the block-diagonal weight tiny).
_MAX_PACK = 8


def _cdiv(a, b):
    return -(-a // b)


def _round_up(a, b):
    return _cdiv(a, b) * b


def _choose_pack(embed_dim):
    """Smallest pack in [1, _MAX_PACK] with (pack * embed_dim) % 128 == 0."""
    for p in range(1, _MAX_PACK + 1):
        if (p * embed_dim) % 128 == 0:
            return p
    return 1  # fallback: masked stores, still correct


def _patch_embed_kernel(x_ref, w_ref, b_ref, o_ref):
    # x_ref: (tm, pK) bf16   w_ref: (pK, pE) bf16   b_ref: (1, pE) f32
    # o_ref: (tm, pE) f32
    acc = jnp.dot(x_ref[...], w_ref[...], preferred_element_type=jnp.float32)
    o_ref[...] = (acc + b_ref[...]).astype(o_ref.dtype)


def _patch_embed_matmul(x4, w_bd, bias_packed, *, tm, n_steps):
    """x4: (M4_pad, pK) bf16, w_bd: (pK, pE) bf16, bias_packed: (1, pE) f32."""
    M4_pad, pK = x4.shape
    _, pE = w_bd.shape
    return pl.pallas_call(
        _patch_embed_kernel,
        out_shape=jax.ShapeDtypeStruct((M4_pad, pE), jnp.float32),
        grid_spec=pltpu.PrefetchScalarGridSpec(
            num_scalar_prefetch=0,
            grid=(n_steps,),
            in_specs=[
                pl.BlockSpec((tm, pK), lambda i: (i, 0)),
                pl.BlockSpec((pK, pE), lambda i: (0, 0)),
                pl.BlockSpec((1, pE), lambda i: (0, 0)),
            ],
            out_specs=pl.BlockSpec((tm, pE), lambda i: (i, 0)),
        ),
        compiler_params=pltpu.CompilerParams(
            dimension_semantics=("parallel",),
            # Allow XLA to fuse the patch transpose/reshape/pad producer into
            # the Pallas input DMA (avoids materializing X4 in HBM first).
            allow_input_fusion=[True, False, False],
        ),
    )(x4, w_bd, bias_packed)


@partial(jax.jit, static_argnames=("patch_size", "embed_dim", "pack"))
def patch_embed_forward(x, w_bd, bias_packed, *, patch_size, embed_dim, pack):
    B, C, H, W = x.shape
    ph = pw = patch_size
    Ho, Wo = H // ph, W // pw
    M = B * Ho * Wo
    K = C * ph * pw
    p = pack

    # bf16 activations: halves HBM bytes on the dominant input stream; the
    # matmul still accumulates in f32 on the MXU.
    xb = x.astype(jnp.bfloat16)

    # Patch extraction, flattened in (c, kh, kw) order to match the PyTorch
    # Conv2d weight flattening.
    xp = xb.reshape(B, C, Ho, ph, Wo, pw)
    xp = jnp.transpose(xp, (0, 2, 4, 1, 3, 5))        # (B, Ho, Wo, C, ph, pw)
    xp = xp.reshape(M, K)

    # Row tiling: big tiles (few grid steps), but keep >= 2 steps when there is
    # enough work so both v7x TensorCores get a share.  All of this is static
    # (shape-derived Python ints).
    M4 = _cdiv(M, p)
    n_steps = max(1, _cdiv(M4, _TILE_ROWS))
    if n_steps == 1 and M4 > 8:
        n_steps = 2
    tm = max(8, _round_up(_cdiv(M4, n_steps), 8))
    M4_pad = tm * n_steps

    pad_rows = M4_pad * p - M
    if pad_rows:
        xp = jnp.pad(xp, ((0, pad_rows), (0, 0)))
    # Lane-dense packing: `p` consecutive patches per row (pure reshape).
    x4 = xp.reshape(M4_pad, p * K)

    out4 = _patch_embed_matmul(x4, w_bd, bias_packed, tm=tm, n_steps=n_steps)

    out = out4.reshape(M4_pad * p, embed_dim)[:M]
    return out.reshape(B, Ho * Wo, embed_dim)


class PatchEmbedPallas:
    """JAX/Pallas re-implementation of the PyTorch PatchEmbed module."""

    def __init__(self, img_size=16, patch_size=4, in_chans=4, embed_dim=32,
                 key=None):
        self.img_size = (img_size, img_size)
        self.patch_size = (patch_size, patch_size)
        self.patches_resolution = [img_size // patch_size, img_size // patch_size]
        self.num_patches = self.patches_resolution[0] * self.patches_resolution[1]
        self.in_chans = in_chans
        self.embed_dim = embed_dim

        # Deterministic parameter init, mimicking nn.Conv2d default
        # (uniform in +/- 1/sqrt(fan_in)).
        if key is None:
            key = jax.random.PRNGKey(0)
        kw, kb = jax.random.split(key)
        fan_in = in_chans * patch_size * patch_size
        bound = 1.0 / math.sqrt(fan_in)
        # weight layout identical to PyTorch Conv2d: (E, C, ph, pw)
        self.weight = jax.random.uniform(
            kw, (embed_dim, in_chans, patch_size, patch_size),
            dtype=jnp.float32, minval=-bound, maxval=bound)
        self.bias = jax.random.uniform(
            kb, (embed_dim,), dtype=jnp.float32, minval=-bound, maxval=bound)

        # --- Kernel-side parameters, precomputed ONCE (not per forward) ---
        K = in_chans * patch_size * patch_size
        w_flat = self.weight.reshape(embed_dim, K).T               # (K, E)

        # Lane packing factor: present `pack` patches per 128-lane-multiple
        # output row (covers embed_dim = 32, 96, 128, 192, ...).
        pack = _choose_pack(embed_dim)
        self.pack = pack

        if pack > 1:
            w_bd = jax.scipy.linalg.block_diag(*([w_flat] * pack))  # (pK, pE)
        else:
            w_bd = w_flat
        self.w_bd = w_bd.astype(jnp.bfloat16)
        self.bias_packed = jnp.tile(self.bias, pack).reshape(1, pack * embed_dim)

        # TODO(synk): norm_layer is None in the reference default; a LayerNorm
        # over embed_dim could be fused into the kernel epilogue if needed.

    def __call__(self, x):
        B, C, H, W = x.shape
        assert H == self.img_size[0] and W == self.img_size[1], (
            f"Input image size ({H}*{W}) doesn't match model "
            f"({self.img_size[0]}*{self.img_size[1]}).")
        return patch_embed_forward(
            x, self.w_bd, self.bias_packed,
            patch_size=self.patch_size[0], embed_dim=self.embed_dim,
            pack=self.pack)


def _reference_patch_embed(x, weight, bias, patch_size):
    """Pure-JAX reference of Conv2d(stride=kernel)+flatten+transpose (f32)."""
    out = jax.lax.conv_general_dilated(
        x, weight,
        window_strides=(patch_size, patch_size),
        padding="VALID",
        dimension_numbers=("NCHW", "OIHW", "NCHW"),
        precision=jax.lax.Precision.HIGHEST,
    ) + bias.reshape(1, -1, 1, 1)
    B, E, Ho, Wo = out.shape
    return jnp.transpose(out.reshape(B, E, Ho * Wo), (0, 2, 1))


if __name__ == "__main__":
    B, C, H, W = 2, 4, 16, 16
    patch_size, embed_dim = 4, 32

    key = jax.random.PRNGKey(0)
    kx, kp = jax.random.split(key)
    x = jax.random.normal(kx, (B, C, H, W), dtype=jnp.float32)

    model = PatchEmbedPallas(img_size=H, patch_size=patch_size,
                             in_chans=C, embed_dim=embed_dim, key=kp)

    out = model(x)
    out = jax.block_until_ready(out)
    assert out.shape == (B, (H // patch_size) * (W // patch_size), embed_dim)

    # Tight check: same bf16-rounded inputs, f32 accumulation (matches kernel
    # arithmetic up to summation order).
    x_bf = x.astype(jnp.bfloat16).astype(jnp.float32)
    w_bf = model.weight.astype(jnp.bfloat16).astype(jnp.float32)
    ref_bf = _reference_patch_embed(x_bf, w_bf, model.bias, patch_size)
    assert jnp.allclose(out, ref_bf, atol=2e-3, rtol=2e-3), "mismatch vs bf16 reference"

    # Loose semantic check against the full-f32 conv reference (bf16-input
    # rounding only).
    ref_f32 = _reference_patch_embed(x, model.weight, model.bias, patch_size)
    assert jnp.allclose(out, ref_f32, atol=5e-2, rtol=5e-2), "mismatch vs f32 reference"

    print("KERNEL_OK")
</pallas_src>

<mosaic_0001>
module attributes {stable_mosaic.version = 11 : i64} {
  func.func @_patch_embed_kernel(%arg0: i32, %arg1: memref<8x256xbf16, #tpu.memory_space<vmem>>, %arg2: memref<256x128xbf16, #tpu.memory_space<vmem>>, %arg3: memref<1x128xf32, #tpu.memory_space<vmem>>, %arg4: memref<8x128xf32, #tpu.memory_space<vmem>>) attributes {dimension_semantics = [#tpu.dimension_semantics<parallel>], iteration_bounds = array<i64: 1>, scalar_prefetch = 0 : i64, scratch_operands = 0 : i64, tpu.core_type = #tpu.core_type<tc>, window_params = [{transform_indices = @transform_0, window_bounds = array<i64: 8, 256>}, {pipeline_mode = #tpu.pipeline_mode<synchronous>, transform_indices = @transform_1, window_bounds = array<i64: 256, 128>}, {pipeline_mode = #tpu.pipeline_mode<synchronous>, transform_indices = @transform_2, window_bounds = array<i64: 1, 128>}, {transform_indices = @transform_3, window_bounds = array<i64: 8, 128>}]} {
    %c0 = arith.constant 0 : index
    %c0_0 = arith.constant 0 : index
    %0 = vector.load %arg1[%c0, %c0_0] : memref<8x256xbf16, #tpu.memory_space<vmem>>, vector<8x256xbf16>
    %c0_1 = arith.constant 0 : index
    %c0_2 = arith.constant 0 : index
    %1 = vector.load %arg2[%c0_1, %c0_2] : memref<256x128xbf16, #tpu.memory_space<vmem>>, vector<256x128xbf16>
    %cst = arith.constant dense<0.000000e+00> : vector<8x128xf32>
    %2 = tpu.matmul %0, %1, %cst {dimension_numbers = #tpu.dot_dimension_numbers<[1], [0], [0], [1], [0, 0, 1, 1], [], []>} : vector<8x256xbf16>, vector<256x128xbf16>, vector<8x128xf32> -> vector<8x128xf32>
    %c0_3 = arith.constant 0 : index
    %c0_4 = arith.constant 0 : index
    %3 = vector.load %arg3[%c0_3, %c0_4] : memref<1x128xf32, #tpu.memory_space<vmem>>, vector<1x128xf32>
    %4 = vector.broadcast %3 : vector<1x128xf32> to vector<8x128xf32>
    %5 = arith.addf %2, %4 : vector<8x128xf32>
    %c0_5 = arith.constant 0 : index
    %c0_6 = arith.constant 0 : index
    %6 = vector.load %arg4[%c0_5, %c0_6] : memref<8x128xf32, #tpu.memory_space<vmem>>, vector<8x128xf32>
    tpu.vector_store %arg4[%c0_5, %c0_6], %5 {strides = array<i32>} : memref<8x128xf32, #tpu.memory_space<vmem>>, vector<8x128xf32>,
    return
  }
  func.func @transform_0(%arg0: i32) -> (i32, i32) {
    %c0_i32 = arith.constant 0 : i32
    %c0_i32_0 = arith.constant 0 : i32
    return %arg0, %c0_i32 : i32, i32
  }
  func.func @transform_1(%arg0: i32) -> (i32, i32) {
    %c0_i32 = arith.constant 0 : i32
    %c0_i32_0 = arith.constant 0 : i32
    %c0_i32_1 = arith.constant 0 : i32
    return %c0_i32, %c0_i32_0 : i32, i32
  }
  func.func @transform_2(%arg0: i32) -> (i32, i32) {
    %c0_i32 = arith.constant 0 : i32
    %c0_i32_0 = arith.constant 0 : i32
    %c0_i32_1 = arith.constant 0 : i32
    return %c0_i32, %c0_i32_0 : i32, i32
  }
  func.func @transform_3(%arg0: i32) -> (i32, i32) {
    %c0_i32 = arith.constant 0 : i32
    %c0_i32_0 = arith.constant 0 : i32
    return %arg0, %c0_i32 : i32, i32
  }
}

</mosaic_0001>

<bundles_post_ra>
// kernel: patch_embed_forward.1
= control target key start
LH: loop header
LB: loop body
LE: loop exit
PB: predicated region body
PF: predicated region fallthrough
CT: control target
= control target key end

     0   :  { %s339_s1 = inlined_call_operand.vmem [shape: bf16[256,128], index: 1, kind: input, shape index: {}]   ;;  %s340_s0 = inlined_call_operand.vmem [shape: bf16[8,256], index: 0, kind: input, shape index: {}]   ;;  %s341_s2 = inlined_call_operand.vmem [shape: f32[1,128], index: 2, kind: input, shape index: {}]   ;;  %s342_s3 = inlined_call_operand.vmem [shape: f32[8,128], index: 3, kind: output, shape index: {}]  }
   0x1   :  { %v244_v0 = vld [vmem:[%s339_s1 + $0x40] sm:$0xff]   ;;  %v246_v2 = vld [vmem:[%s339_s1 + $0x48] sm:$0xff]   ;;  %v248_v4 = vld [vmem:[%s339_s1 + $0x50] sm:$0xff]  }
   0x2   :  { %v245_v1 = vld [vmem:[%s339_s1] sm:$0xff]   ;;  %222 = vmatprep.subr.bf16.mxu0 %v244_v0  ;;  %v247_v3 = vld [vmem:[%s339_s1 + $0x8] sm:$0xff]   ;;  %v249_v5 = vld [vmem:[%s339_s1 + $0x10] sm:$0xff]  }
   0x3   :  { %223 = vmatpush3.bf16.msra.mxu0 %v245_v1  ;;  %v250_v6 = vld [vmem:[%s339_s1 + $0x58] sm:$0xff]   ;;  %v252_v8 = vld [vmem:[%s339_s1 + $0x60] sm:$0xff]   ;;  %v254_v10 = vld [vmem:[%s339_s1 + $0x68] sm:$0xff]  }
   0x4   :  { %224 = vmatprep.subr.bf16.mxu0 %v246_v2  ;;  %v251_v7 = vld [vmem:[%s339_s1 + $0x18] sm:$0xff]   ;;  %v253_v9 = vld [vmem:[%s339_s1 + $0x20] sm:$0xff]   ;;  %v255_v13 = vld [vmem:[%s339_s1 + $0x28] sm:$0xff]  }
   0x5   :  { %v15_v11 = vld [vmem:[%s340_s0] sm:$0xff]  ;;  %v256_v14 = vld [vmem:[%s339_s1 + $0x70] sm:$0xff]   ;;  %v258_v16 = vld [vmem:[%s339_s1 + $0x78] sm:$0xff]  }
   0x6   :  { %v205_v12 = vcombine.high %v15_v11, %v15_v11  ;;  %v257_v15 = vld [vmem:[%s339_s1 + $0x30] sm:$0xff]   ;;  %v259_v17 = vld [vmem:[%s339_s1 + $0x38] sm:$0xff]   ;;  %v204_v18 = vcombine.low %v15_v11, %v15_v11  ;;  %v203_v20 = vld [vmem:[%s341_s2] ss:$0 sm:$0xff] }
   0x7   :  { %225 = vmatpush3.bf16.msra.mxu0 %v247_v3 }
   0x8   :  { %226 = vmatprep.subr.bf16.mxu0 %v248_v4  ;;  %190 = vmatprep.mubr.bf16.mxu0 %v205_v12 }
   0xb   :  { %227 = vmatpush3.bf16.msra.mxu0 %v249_v5 }
   0xc   :  { %228 = vmatprep.subr.bf16.mxu0 %v250_v6 }
   0xf   :  { %229 = vmatpush3.bf16.msra.mxu0 %v251_v7 }
  0x10   :  { %230 = vmatprep.subr.bf16.mxu0 %v252_v8 }
  0x13   :  { %231 = vmatpush3.bf16.msra.mxu0 %v253_v9 }
  0x14   :  { %232 = vmatprep.subr.bf16.mxu0 %v254_v10 }
  0x17   :  { %233 = vmatpush3.bf16.msra.mxu0 %v255_v13 }
  0x18   :  { %234 = vmatprep.subr.bf16.mxu0 %v256_v14 }
  0x1b   :  { %235 = vmatpush3.bf16.msra.mxu0 %v257_v15 }
  0x1c   :  { %236 = vmatprep.subr.bf16.mxu0 %v258_v16 }
  0x1f   :  { %237 = vmatpush3.bf16.msra.mxu0 %v259_v17 }
  0x22   :  { %191 = vmatmul.mubr.bf16.vlgmr.msra.gmra.mrb[0].mxu0 %v204_v18 }
  0xf5   :  { %v238_v19 = vpop.f32.mrb[0].mxu0 }
  0xf6   :  { %v239_v21 = vpop.f32.mrb[1].mxu0 }
  0xf7   :  { %v240_v22 = vadd.f32 %v239_v21, %v238_v19  ;;  %v241_v23 = vpop.f32.mrb[2].mxu0 }
  0xf8   :  { %v242_v24 = vpop.f32.mrb[3].mxu0 }
  0xf9   :  { %v193_v25 = vadd.f32 %v240_v22, %v203_v20 }
  0xfb   :  { %198 = vst [vmem:[%s342_s3] sm:$0xff] %v193_v25 }

</bundles_post_ra>
